<compile_context>
chip_gen: v7x
topology: tpu7x:2x2x1
jax: 0.10.0
libtpu: 0.0.40
codegen_flags: <defaults>
</compile_context>

<pallas_src>
import functools

import jax
import jax.numpy as jnp
from jax import lax
from jax.experimental import pallas as pl
from jax.experimental.pallas import tpu as pltpu


_GATE_LANES = 128          # gate logits padded to one full lane tile
_NEG_FILL = -1e30          # padded gate lanes: never win the argmax


def _vit_moe_kernel(patches_ref, pos_ref, w_embed_ref,
                    w_fused_ref, b_fused_ref,
                    pool_ref, expand_ref,
                    w_cls_ref, b_cls_ref,
                    out_ref,
                    *, gate_lanes, ed_pad):
    GP = gate_lanes
    BtN = patches_ref.shape[0]

    # --- patch embedding (+ positional embedding; embed bias folded in pos) ---
    h = jnp.dot(patches_ref[...], w_embed_ref[...],
                preferred_element_type=jnp.float32) + pos_ref[...]        # (BtN, d)

    # --- one fused matmul: [gate (128 lanes, pad bias=-1e30) | all experts] ---
    fused = jnp.dot(h, w_fused_ref[...],
                    preferred_element_type=jnp.float32) + b_fused_ref[...]
    gate = fused[:, :GP]                                                  # (BtN, GP)
    expert_all = jnp.maximum(fused[:, GP:], 0.0)                          # (BtN, Ed_pad)

    # --- top-1 routing (first index on ties, matches torch argmax) ---
    max_val = jnp.max(gate, axis=-1, keepdims=True)                       # (BtN, 1)
    lane = lax.broadcasted_iota(jnp.int32, (BtN, GP), 1)
    top1 = jnp.min(jnp.where(gate >= max_val, lane, GP),
                   axis=-1, keepdims=True)                                # (BtN, 1)
    one_hot = (lane == top1).astype(jnp.float32)                          # (BtN, GP)

    # --- ONE pooling matmul: per-image expert means and expert counts (/N) ---
    stacked = jnp.concatenate([expert_all, one_hot], axis=1)              # (BtN, Ed_pad+GP)
    pooled = jnp.dot(pool_ref[...], stacked,
                     preferred_element_type=jnp.float32)                  # (Bt, Ed_pad+GP)
    expert_mean = pooled[:, :ed_pad]                                      # (Bt, Ed_pad)
    scale = pooled[:, ed_pad:]                                            # (Bt, GP)

    # expand per-expert scale across each expert's d lanes with a tiny matmul
    # against a precomputed constant (replaces the old (BtN, E*d) one-hot).
    scale_wide = jnp.dot(scale, expand_ref[...],
                         preferred_element_type=jnp.float32)              # (Bt, Ed_pad)
    weighted = expert_mean * scale_wide                                   # (Bt, Ed_pad)

    # classifier: w_cls tiled E times folds the sum over expert blocks;
    # output slab is lane-dense (C padded to 128).
    out_ref[...] = jnp.dot(weighted, w_cls_ref[...],
                           preferred_element_type=jnp.float32) + b_cls_ref[...]


def extract_patches(x, patch_size):
    """Exact equivalent of torch unfold(2,P,P).unfold(3,P,P).contiguous().view(B,N,-1)."""
    B, C, H, W = x.shape
    P = patch_size
    GH, GW = H // P, W // P
    p6 = x.reshape(B, C, GH, P, GW, P).transpose(0, 1, 2, 4, 3, 5)  # (B,C,GH,GW,P,P)
    return p6.reshape(B, GH * GW, C * P * P)


def vit_moe_forward(x, params, *, patch_size, num_experts):
    B = x.shape[0]
    patches = extract_patches(x, patch_size).astype(jnp.float32)     # (B, N, Pd)
    _, N, Pd = patches.shape
    d_model = params["w_embed"].shape[1]
    num_classes = params["w_cls"].shape[1]
    E = num_experts
    GP = _GATE_LANES
    assert E <= GP, "num_experts must fit in one lane tile"
    Ed = E * d_model
    Ed_pad = ((Ed + 127) // 128) * 128
    C_pad = ((num_classes + 127) // 128) * 128

    # --- batch tile: target ~1024 token rows per grid step ---------------------
    target_rows = 1024
    Bt = max(1, target_rows // N)
    if Bt >= B:
        if B >= 16:
            # keep >= 2 grid steps so the parallel axis can shard across v7x's 2 TCs
            Bt = max(8, (((B + 1) // 2) // 8) * 8)
        else:
            Bt = B                                # tiny batch: single grid step
    else:
        Bt = max(8, (Bt // 8) * 8)                # sublane-aligned output block
    n_steps = pl.cdiv(B, Bt)
    B_pad = n_steps * Bt

    if B_pad != B:
        patches = jnp.pad(patches, ((0, B_pad - B), (0, 0), (0, 0)))
    patches_flat = patches.reshape(B_pad * N, Pd)                     # (B_pad*N, Pd)

    # --- precomputed constant operands (constant-index blocks, one DMA each) ---
    pos_bias = params["pos"] + params["b_embed"]                      # fold embed bias
    pos_tiled = jnp.tile(pos_bias, (Bt, 1))                           # (Bt*N, d)

    # fused [gate | stacked experts] weight and bias
    w_gate_pad = jnp.pad(params["w_gate"], ((0, 0), (0, GP - E)))
    b_gate_pad = jnp.pad(params["b_gate"], ((0, 0), (0, GP - E)),
                         constant_values=_NEG_FILL)
    w_exp_stacked = jnp.transpose(params["w_exp"], (1, 0, 2)).reshape(d_model, Ed)
    w_exp_stacked = jnp.pad(w_exp_stacked, ((0, 0), (0, Ed_pad - Ed)))
    b_exp_stacked = jnp.pad(params["b_exp"].reshape(1, Ed), ((0, 0), (0, Ed_pad - Ed)))
    w_fused = jnp.concatenate([w_gate_pad, w_exp_stacked], axis=1)    # (d, GP+Ed_pad)
    b_fused = jnp.concatenate([b_gate_pad, b_exp_stacked], axis=1)    # (1, GP+Ed_pad)

    # per-image token-mean pooling matrix; the 1/N MoE factor is folded in once.
    row_b = jnp.arange(Bt)[:, None]
    tok_b = jnp.arange(Bt * N)[None, :] // N
    pool = jnp.where(row_b == tok_b, 1.0 / N, 0.0).astype(jnp.float32)  # (Bt, Bt*N)

    # expert-scale expansion: expand[e, e*d:(e+1)*d] = 1 for e < E, else 0.
    gp_row = jnp.arange(GP)[:, None]
    col_e = jnp.arange(Ed_pad)[None, :] // d_model
    expand_mat = ((gp_row == col_e) & (gp_row < E)).astype(jnp.float32)  # (GP, Ed_pad)

    # classifier tiled E times vertically (folds the sum over expert blocks),
    # zero rows for the Ed padding, lanes padded to 128 classes.
    w_cls_tiled = jnp.tile(params["w_cls"], (E, 1))                   # (Ed, C)
    w_cls_tiled = jnp.pad(w_cls_tiled,
                          ((0, Ed_pad - Ed), (0, C_pad - num_classes)))
    b_cls_pad = jnp.pad(params["b_cls"], ((0, 0), (0, C_pad - num_classes)))

    kernel = functools.partial(_vit_moe_kernel, gate_lanes=GP, ed_pad=Ed_pad)

    const2 = lambda g: (0, 0)
    if n_steps >= 3:
        # deep enough pipeline: 3-deep buffering hides the streamed patch DMA
        patches_spec = pl.BlockSpec((Bt * N, Pd), lambda g: (g, 0),
                                    pipeline_mode=pl.Buffered(3))
    else:
        patches_spec = pl.BlockSpec((Bt * N, Pd), lambda g: (g, 0))

    out = pl.pallas_call(
        kernel,
        out_shape=jax.ShapeDtypeStruct((B_pad, C_pad), jnp.float32),
        grid_spec=pltpu.PrefetchScalarGridSpec(
            num_scalar_prefetch=0,
            grid=(n_steps,),
            in_specs=[
                patches_spec,                                      # patches (streamed)
                pl.BlockSpec((Bt * N, d_model), const2),           # pos (+ b_embed)
                pl.BlockSpec((Pd, d_model), const2),               # w_embed
                pl.BlockSpec((d_model, GP + Ed_pad), const2),      # w_fused
                pl.BlockSpec((1, GP + Ed_pad), const2),            # b_fused
                pl.BlockSpec((Bt, Bt * N), const2),                # pool matrix
                pl.BlockSpec((GP, Ed_pad), const2),                # expand matrix
                pl.BlockSpec((Ed_pad, C_pad), const2),             # w_cls tiled+pad
                pl.BlockSpec((1, C_pad), const2),                  # b_cls pad
            ],
            out_specs=pl.BlockSpec((Bt, C_pad), lambda g: (g, 0)),
        ),
        compiler_params=pltpu.CompilerParams(
            dimension_semantics=("parallel",)),
    )(patches_flat, pos_tiled, params["w_embed"], w_fused, b_fused,
      pool, expand_mat, w_cls_tiled, b_cls_pad)

    return out[:B, :num_classes]                                      # (B, num_classes)


def reference_forward(x, params, *, patch_size, num_experts):
    """Pure-JAX reference mirroring the PyTorch forward exactly (vectorized)."""
    patches = extract_patches(x, patch_size).astype(jnp.float32)
    B, N, _ = patches.shape
    h = patches @ params["w_embed"] + params["b_embed"] + params["pos"]      # (B,N,d)
    gate = h @ params["w_gate"] + params["b_gate"]                           # (B,N,E)
    top1 = jnp.argmax(gate, axis=-1)                                         # (B,N)
    counts = jax.nn.one_hot(top1, num_experts, dtype=jnp.float32).sum(axis=1)  # (B,E)
    per_expert = jax.nn.relu(
        jnp.einsum("bnd,edf->benf", h, params["w_exp"])
        + params["b_exp"][:, 0, :][None, :, None, :])                        # (B,E,N,d)
    moe = jnp.einsum("be,benf->bnf", counts, per_expert) / N                 # (B,N,d)
    pooled = moe.mean(axis=1)
    return pooled @ params["w_cls"] + params["b_cls"][0]


def init_params(key, *, patch_size, num_patches, d_model, num_experts, num_classes):
    Pd = patch_size * patch_size * 3
    ks = jax.random.split(key, 10)
    s = 0.05
    return {
        # weights stored pre-transposed so forward does x @ W (+ b)
        "w_embed": s * jax.random.normal(ks[0], (Pd, d_model), jnp.float32),
        "b_embed": s * jax.random.normal(ks[1], (1, d_model), jnp.float32),
        "pos":     jax.random.normal(ks[2], (num_patches, d_model), jnp.float32),
        "w_gate":  s * jax.random.normal(ks[3], (d_model, num_experts), jnp.float32),
        "b_gate":  s * jax.random.normal(ks[4], (1, num_experts), jnp.float32),
        "w_exp":   s * jax.random.normal(ks[5], (num_experts, d_model, d_model), jnp.float32),
        "b_exp":   s * jax.random.normal(ks[6], (num_experts, 1, d_model), jnp.float32),
        "w_cls":   s * jax.random.normal(ks[7], (d_model, num_classes), jnp.float32),
        "b_cls":   s * jax.random.normal(ks[8], (1, num_classes), jnp.float32),
    }


if __name__ == "__main__":
    # Small shapes consistent with the module
    batch = 2
    image_size = 16
    patch_size = 4
    num_classes = 10
    d_model = 32
    num_experts = 4
    num_patches = (image_size // patch_size) ** 2  # 16

    key = jax.random.PRNGKey(0)
    k_x, k_p = jax.random.split(key)
    x = jax.random.normal(k_x, (batch, 3, image_size, image_size), jnp.float32)  # NCHW
    params = init_params(k_p, patch_size=patch_size, num_patches=num_patches,
                         d_model=d_model, num_experts=num_experts,
                         num_classes=num_classes)

    out = vit_moe_forward(x, params, patch_size=patch_size, num_experts=num_experts)
    out = jax.block_until_ready(out)

    ref = reference_forward(x, params, patch_size=patch_size, num_experts=num_experts)
    assert out.shape == (batch, num_classes)
    assert jnp.allclose(out, ref, atol=1e-4, rtol=1e-4), (out, ref)

    print("KERNEL_OK")
</pallas_src>

<mosaic_0001>
module attributes {stable_mosaic.version = 11 : i64} {
  func.func @_vit_moe_kernel(%arg0: i32, %arg1: memref<32x48xf32, #tpu.memory_space<vmem>>, %arg2: memref<32x32xf32, #tpu.memory_space<vmem>>, %arg3: memref<48x32xf32, #tpu.memory_space<vmem>>, %arg4: memref<32x256xf32, #tpu.memory_space<vmem>>, %arg5: memref<1x256xf32, #tpu.memory_space<vmem>>, %arg6: memref<2x32xf32, #tpu.memory_space<vmem>>, %arg7: memref<128x128xf32, #tpu.memory_space<vmem>>, %arg8: memref<128x128xf32, #tpu.memory_space<vmem>>, %arg9: memref<1x128xf32, #tpu.memory_space<vmem>>, %arg10: memref<2x128xf32, #tpu.memory_space<vmem>>) attributes {dimension_semantics = [#tpu.dimension_semantics<parallel>], iteration_bounds = array<i64: 1>, scalar_prefetch = 0 : i64, scratch_operands = 0 : i64, tpu.core_type = #tpu.core_type<tc>, window_params = [{transform_indices = @transform_0, window_bounds = array<i64: 32, 48>}, {pipeline_mode = #tpu.pipeline_mode<synchronous>, transform_indices = @transform_1, window_bounds = array<i64: 32, 32>}, {pipeline_mode = #tpu.pipeline_mode<synchronous>, transform_indices = @transform_2, window_bounds = array<i64: 48, 32>}, {pipeline_mode = #tpu.pipeline_mode<synchronous>, transform_indices = @transform_3, window_bounds = array<i64: 32, 256>}, {pipeline_mode = #tpu.pipeline_mode<synchronous>, transform_indices = @transform_4, window_bounds = array<i64: 1, 256>}, {pipeline_mode = #tpu.pipeline_mode<synchronous>, transform_indices = @transform_5, window_bounds = array<i64: 2, 32>}, {pipeline_mode = #tpu.pipeline_mode<synchronous>, transform_indices = @transform_6, window_bounds = array<i64: 128, 128>}, {pipeline_mode = #tpu.pipeline_mode<synchronous>, transform_indices = @transform_7, window_bounds = array<i64: 128, 128>}, {pipeline_mode = #tpu.pipeline_mode<synchronous>, transform_indices = @transform_8, window_bounds = array<i64: 1, 128>}, {transform_indices = @transform_9, window_bounds = array<i64: 2, 128>}]} {
    %c0 = arith.constant 0 : index
    %c0_0 = arith.constant 0 : index
    %0 = vector.load %arg1[%c0, %c0_0] : memref<32x48xf32, #tpu.memory_space<vmem>>, vector<32x48xf32>
    %c0_1 = arith.constant 0 : index
    %c0_2 = arith.constant 0 : index
    %1 = vector.load %arg3[%c0_1, %c0_2] : memref<48x32xf32, #tpu.memory_space<vmem>>, vector<48x32xf32>
    %cst = arith.constant dense<0.000000e+00> : vector<32x32xf32>
    %2 = tpu.matmul %0, %1, %cst {dimension_numbers = #tpu.dot_dimension_numbers<[1], [0], [0], [1], [0, 0, 1, 1], [], []>} : vector<32x48xf32>, vector<48x32xf32>, vector<32x32xf32> -> vector<32x32xf32>
    %c0_3 = arith.constant 0 : index
    %c0_4 = arith.constant 0 : index
    %3 = vector.load %arg2[%c0_3, %c0_4] : memref<32x32xf32, #tpu.memory_space<vmem>>, vector<32x32xf32>
    %4 = arith.addf %2, %3 : vector<32x32xf32>
    %c0_5 = arith.constant 0 : index
    %c0_6 = arith.constant 0 : index
    %5 = vector.load %arg4[%c0_5, %c0_6] : memref<32x256xf32, #tpu.memory_space<vmem>>, vector<32x256xf32>
    %cst_7 = arith.constant dense<0.000000e+00> : vector<32x256xf32>
    %6 = tpu.matmul %4, %5, %cst_7 {dimension_numbers = #tpu.dot_dimension_numbers<[1], [0], [0], [1], [0, 0, 1, 1], [], []>} : vector<32x32xf32>, vector<32x256xf32>, vector<32x256xf32> -> vector<32x256xf32>
    %c0_8 = arith.constant 0 : index
    %c0_9 = arith.constant 0 : index
    %7 = vector.load %arg5[%c0_8, %c0_9] : memref<1x256xf32, #tpu.memory_space<vmem>>, vector<1x256xf32>
    %8 = vector.broadcast %7 : vector<1x256xf32> to vector<32x256xf32>
    %9 = arith.addf %6, %8 : vector<32x256xf32>
    %10 = vector.extract_strided_slice %9 {offsets = [0, 0], sizes = [32, 128], strides = [1, 1]} : vector<32x256xf32> to vector<32x128xf32>
    %11 = vector.extract_strided_slice %9 {offsets = [0, 128], sizes = [32, 128], strides = [1, 1]} : vector<32x256xf32> to vector<32x128xf32>
    %cst_10 = arith.constant 0.000000e+00 : f32
    %12 = vector.broadcast %cst_10 : f32 to vector<32x128xf32>
    %13 = arith.maximumf %11, %12 : vector<32x128xf32>
    %cst_11 = arith.constant dense<0xFF800000> : vector<32xf32>
    %14 = vector.multi_reduction <maximumf>, %10, %cst_11 [1] : vector<32x128xf32> to vector<32xf32>
    %15 = vector.shape_cast %14 : vector<32xf32> to vector<32x1xf32>
    %16 = tpu.iota {dimensions = array<i32: 1>} : vector<32x128xi32>
    %17 = vector.broadcast %15 : vector<32x1xf32> to vector<32x128xf32>
    %18 = arith.cmpf oge, %10, %17 : vector<32x128xf32>
    %c128_i32 = arith.constant 128 : i32
    %19 = vector.broadcast %c128_i32 : i32 to vector<32x128xi32>
    %20 = arith.select %18, %16, %19 : vector<32x128xi1>, vector<32x128xi32>
    %cst_12 = arith.constant dense<2147483647> : vector<32xi32>
    %21 = vector.multi_reduction <minsi>, %20, %cst_12 [1] : vector<32x128xi32> to vector<32xi32>
    %22 = vector.shape_cast %21 : vector<32xi32> to vector<32x1xi32>
    %23 = vector.broadcast %22 : vector<32x1xi32> to vector<32x128xi32>
    %24 = arith.cmpi eq, %16, %23 : vector<32x128xi32>
    %25 = arith.extui %24 : vector<32x128xi1> to vector<32x128xi32>
    %26 = arith.sitofp %25 : vector<32x128xi32> to vector<32x128xf32>
    %27 = tpu.concatenate %13, %26 in 1 : vector<32x128xf32>, vector<32x128xf32> -> vector<32x256xf32>
    %c0_13 = arith.constant 0 : index
    %c0_14 = arith.constant 0 : index
    %28 = vector.load %arg6[%c0_13, %c0_14] : memref<2x32xf32, #tpu.memory_space<vmem>>, vector<2x32xf32>
    %cst_15 = arith.constant dense<0.000000e+00> : vector<2x256xf32>
    %29 = tpu.matmul %28, %27, %cst_15 {dimension_numbers = #tpu.dot_dimension_numbers<[1], [0], [0], [1], [0, 0, 1, 1], [], []>} : vector<2x32xf32>, vector<32x256xf32>, vector<2x256xf32> -> vector<2x256xf32>
    %30 = vector.extract_strided_slice %29 {offsets = [0, 0], sizes = [2, 128], strides = [1, 1]} : vector<2x256xf32> to vector<2x128xf32>
    %31 = vector.extract_strided_slice %29 {offsets = [0, 128], sizes = [2, 128], strides = [1, 1]} : vector<2x256xf32> to vector<2x128xf32>
    %c0_16 = arith.constant 0 : index
    %c0_17 = arith.constant 0 : index
    %32 = vector.load %arg7[%c0_16, %c0_17] : memref<128x128xf32, #tpu.memory_space<vmem>>, vector<128x128xf32>
    %cst_18 = arith.constant dense<0.000000e+00> : vector<2x128xf32>
    %33 = tpu.matmul %31, %32, %cst_18 {dimension_numbers = #tpu.dot_dimension_numbers<[1], [0], [0], [1], [0, 0, 1, 1], [], []>} : vector<2x128xf32>, vector<128x128xf32>, vector<2x128xf32> -> vector<2x128xf32>
    %34 = arith.mulf %30, %33 : vector<2x128xf32>
    %c0_19 = arith.constant 0 : index
    %c0_20 = arith.constant 0 : index
    %35 = vector.load %arg8[%c0_19, %c0_20] : memref<128x128xf32, #tpu.memory_space<vmem>>, vector<128x128xf32>
    %cst_21 = arith.constant dense<0.000000e+00> : vector<2x128xf32>
    %36 = tpu.matmul %34, %35, %cst_21 {dimension_numbers = #tpu.dot_dimension_numbers<[1], [0], [0], [1], [0, 0, 1, 1], [], []>} : vector<2x128xf32>, vector<128x128xf32>, vector<2x128xf32> -> vector<2x128xf32>
    %c0_22 = arith.constant 0 : index
    %c0_23 = arith.constant 0 : index
    %37 = vector.load %arg9[%c0_22, %c0_23] : memref<1x128xf32, #tpu.memory_space<vmem>>, vector<1x128xf32>
    %38 = vector.broadcast %37 : vector<1x128xf32> to vector<2x128xf32>
    %39 = arith.addf %36, %38 : vector<2x128xf32>
    %c0_24 = arith.constant 0 : index
    %c0_25 = arith.constant 0 : index
    %40 = vector.load %arg10[%c0_24, %c0_25] : memref<2x128xf32, #tpu.memory_space<vmem>>, vector<2x128xf32>
    tpu.vector_store %arg10[%c0_24, %c0_25], %39 {strides = array<i32>} : memref<2x128xf32, #tpu.memory_space<vmem>>, vector<2x128xf32>,
    return
  }
  func.func @transform_0(%arg0: i32) -> (i32, i32) {
    %c0_i32 = arith.constant 0 : i32
    %c0_i32_0 = arith.constant 0 : i32
    return %arg0, %c0_i32 : i32, i32
  }
  func.func @transform_1(%arg0: i32) -> (i32, i32) {
    %c0_i32 = arith.constant 0 : i32
    %c0_i32_0 = arith.constant 0 : i32
    %c0_i32_1 = arith.constant 0 : i32
    return %c0_i32, %c0_i32_0 : i32, i32
  }
  func.func @transform_2(%arg0: i32) -> (i32, i32) {
    %c0_i32 = arith.constant 0 : i32
    %c0_i32_0 = arith.constant 0 : i32
    %c0_i32_1 = arith.constant 0 : i32
    return %c0_i32, %c0_i32_0 : i32, i32
  }
  func.func @transform_3(%arg0: i32) -> (i32, i32) {
    %c0_i32 = arith.constant 0 : i32
    %c0_i32_0 = arith.constant 0 : i32
    %c0_i32_1 = arith.constant 0 : i32
    return %c0_i32, %c0_i32_0 : i32, i32
  }
  func.func @transform_4(%arg0: i32) -> (i32, i32) {
    %c0_i32 = arith.constant 0 : i32
    %c0_i32_0 = arith.constant 0 : i32
    %c0_i32_1 = arith.constant 0 : i32
    return %c0_i32, %c0_i32_0 : i32, i32
  }
  func.func @transform_5(%arg0: i32) -> (i32, i32) {
    %c0_i32 = arith.constant 0 : i32
    %c0_i32_0 = arith.constant 0 : i32
    %c0_i32_1 = arith.constant 0 : i32
    return %c0_i32, %c0_i32_0 : i32, i32
  }
  func.func @transform_6(%arg0: i32) -> (i32, i32) {
    %c0_i32 = arith.constant 0 : i32
    %c0_i32_0 = arith.constant 0 : i32
    %c0_i32_1 = arith.constant 0 : i32
    return %c0_i32, %c0_i32_0 : i32, i32
  }
  func.func @transform_7(%arg0: i32) -> (i32, i32) {
    %c0_i32 = arith.constant 0 : i32
    %c0_i32_0 = arith.constant 0 : i32
    %c0_i32_1 = arith.constant 0 : i32
    return %c0_i32, %c0_i32_0 : i32, i32
  }
  func.func @transform_8(%arg0: i32) -> (i32, i32) {
    %c0_i32 = arith.constant 0 : i32
    %c0_i32_0 = arith.constant 0 : i32
    %c0_i32_1 = arith.constant 0 : i32
    return %c0_i32, %c0_i32_0 : i32, i32
  }
  func.func @transform_9(%arg0: i32) -> (i32, i32) {
    %c0_i32 = arith.constant 0 : i32
    %c0_i32_0 = arith.constant 0 : i32
    return %arg0, %c0_i32 : i32, i32
  }
}

</mosaic_0001>

<bundles_post_ra>
// kernel: tpu_custom_call.1
= control target key start
LH: loop header
LB: loop body
LE: loop exit
PB: predicated region body
PF: predicated region fallthrough
CT: control target
= control target key end

     0   :  { %14 = vsyncpa [#allocation3], 0  ;;  %s1302_s0 = inlined_call_operand.hbm [shape: f32[32,48], index: 0, kind: input, shape index: {}]   ;;  %s1303_s1 = inlined_call_operand.hbm [shape: f32[32,32], index: 1, kind: input, shape index: {}]   ;;  %s1304_s2 = inlined_call_operand.vmem [shape: f32[48,32], index: 2, kind: input, shape index: {}]   ;;  %s1305_s3 = inlined_call_operand.vmem [shape: f32[32,256], index: 3, kind: input, shape index: {}]   ;;  %s1306_s4 = inlined_call_operand.vmem [shape: f32[1,256], index: 4, kind: input, shape index: {}]   ;;  %s1307_s5 = inlined_call_operand.vmem [shape: f32[2,32], index: 5, kind: input, shape index: {}]   ;;  %s1308_s6 = inlined_call_operand.hbm [shape: f32[128,128], index: 6, kind: input, shape index: {}]   ;;  %s1309_s7 = inlined_call_operand.hbm [shape: f32[128,128], index: 7, kind: input, shape index: {}]   ;;  %s1310_s8 = inlined_call_operand.vmem [shape: f32[1,128], index: 8, kind: input, shape index: {}]   ;;  %s1311_s9 = inlined_call_operand.hbm [shape: f32[2,128], index: 9, kind: output, shape index: {}]  }
   0x1   :  { %15 = vsyncpa [#allocation6], 0 }
   0x2   :  { %16 = vsyncpa [#allocation9], 0 }
   0x3   :  { %17 = vsyncpa [#allocation4], 0  ;;  %s1040_s30 = smov [#allocation5]   ;;  %s1041_s11 = smov [#allocation2]  }
   0x4   :  { %s35_s10 = sshll.u32 %s1040_s30, 4  ;;  %s23_s12 = sshll.u32 %s1041_s11, 4  ;;  %s36_s10 = int_to_ptr.vmem [resolvable:$true] %s35_s10  ;;  %s1101_s12 = int_to_ptr.vmem [resolvable:$true] %s23_s12 }
   0x5   :  { %s922_s15 = scalar_lea.hbm %s1303_s1, 512 }
   0x6   :  { %p923_p0 = scmp.ne.s32.totalorder %s1303_s1, %s922_s15  ;;  %p926_p1 = scmp.lt.u32.totalorder %s922_s15, %s1303_s1 }
   0x8   :  { %p928_p2 = pnand %p926_p1, %p923_p0 }
   0xa   :  { %931 = shalt.err (!%p928_p2)
}
   0xb   :  { %s932_s20 = scalar_lea.vmem %s36_s10, 512  ;;  %p937_p4 = scmp.lt.s32.totalorder %s36_s10, %s36_s10 }
   0xc   :  { %p933_p3 = scmp.ne.s32.totalorder %s36_s10, %s932_s20  ;;  %p938_p5 = scmp.lt.s32.totalorder %s932_s20, %s932_s20 }
   0xe   :  { %p939_p6 = por %p938_p5, %p937_p4 }
  0x10   :  { %p940_p7 = pnand %p939_p6, %p933_p3 }
  0x12   :  { %943 = shalt.err (!%p940_p7)
}
  0x13   :  { %s1042_s21 = smov 128   ;;  %s1043_s22 = smov 8  }
  0x14   :  { %41 = dma.hbm_to_vmem [thread:$0]  %s1303_s1, 512, %s36_s10, [#allocation6], %s1042_s21, %s1042_s21, %s1043_s22  }
  0x15   :  { %s944_s27 = scalar_lea.hbm %s1302_s0, 512 }
  0x16   :  { %p945_p8 = scmp.ne.s32.totalorder %s1302_s0, %s944_s27  ;;  %p948_p9 = scmp.lt.u32.totalorder %s944_s27, %s1302_s0 }
  0x18   :  { %p950_p10 = pnand %p948_p9, %p945_p8 }
  0x1a   :  { %953 = shalt.err (!%p950_p10)
}
  0x1b   :  { %s954_s13 = scalar_lea.vmem %s1101_s12, 512  ;;  %p959_p12 = scmp.lt.s32.totalorder %s1101_s12, %s1101_s12 }
  0x1c   :  { %p955_p11 = scmp.ne.s32.totalorder %s1101_s12, %s954_s13  ;;  %p960_p13 = scmp.lt.s32.totalorder %s954_s13, %s954_s13 }
  0x1e   :  { %p961_p0 = por %p960_p13, %p959_p12 }
  0x20   :  { %p962_p1 = pnand %p961_p0, %p955_p11 }
  0x22   :  { %965 = shalt.err (!%p962_p1)
}
  0x23   :  { %29 = dma.hbm_to_vmem [thread:$0]  %s1302_s0, 512, %s1101_s12, [#allocation3], %s1042_s21, %s1042_s21, %s1043_s22  }
  0x24   :  { %s1044_s14 = smov [#allocation7]   ;;  %s1045_s16 = smov [#allocation8]  }
  0x25   :  { %s55_s15 = sshll.u32 %s1044_s14, 4  ;;  %s67_s17 = sshll.u32 %s1045_s16, 4  ;;  %s56_s15 = int_to_ptr.vmem [resolvable:$true] %s55_s15  ;;  %s1138_s17 = int_to_ptr.vmem [resolvable:$true] %s67_s17 }
  0x26   :  { %s966_s20 = scalar_lea.hbm %s1308_s6, 2048 }
  0x27   :  { %p967_p2 = scmp.ne.s32.totalorder %s1308_s6, %s966_s20  ;;  %p970_p3 = scmp.lt.u32.totalorder %s966_s20, %s1308_s6 }
  0x29   :  { %p972_p4 = pnand %p970_p3, %p967_p2 }
  0x2b   :  { %975 = shalt.err (!%p972_p4)
}
  0x2c   :  { %s976_s0 = scalar_lea.vmem %s56_s15, 2048  ;;  %p981_p6 = scmp.lt.s32.totalorder %s56_s15, %s56_s15 }
  0x2d   :  { %p977_p5 = scmp.ne.s32.totalorder %s56_s15, %s976_s0  ;;  %p982_p7 = scmp.lt.s32.totalorder %s976_s0, %s976_s0 }
  0x2f   :  { %p983_p8 = por %p982_p7, %p981_p6 }
  0x31   :  { %p984_p9 = pnand %p983_p8, %p977_p5 }
  0x33   :  { %987 = shalt.err (!%p984_p9)
}
  0x34   :  { %61 = dma.hbm_to_vmem [thread:$0]  %s1308_s6, 2048, %s56_s15, [#allocation6], %s1042_s21, %s1042_s21, %s1043_s22  }
  0x35   :  { %s988_s30 = scalar_lea.hbm %s1309_s7, 2048 }
  0x36   :  { %p989_p10 = scmp.ne.s32.totalorder %s1309_s7, %s988_s30  ;;  %p992_p11 = scmp.lt.u32.totalorder %s988_s30, %s1309_s7 }
  0x38   :  { %p994_p12 = pnand %p992_p11, %p989_p10 }
  0x3a   :  { %997 = shalt.err (!%p994_p12)
}
  0x3b   :  { %s998_s14 = scalar_lea.vmem %s1138_s17, 2048  ;;  %p1003_p0 = scmp.lt.s32.totalorder %s1138_s17, %s1138_s17 }
  0x3c   :  { %p999_p13 = scmp.ne.s32.totalorder %s1138_s17, %s998_s14  ;;  %p1004_p1 = scmp.lt.s32.totalorder %s998_s14, %s998_s14 }
  0x3e   :  { %p1005_p2 = por %p1004_p1, %p1003_p0 }
  0x40   :  { %p1006_p3 = pnand %p1005_p2, %p999_p13 }
  0x42   :  { %1009 = shalt.err (!%p1006_p3)
}
  0x43   :  { %73 = dma.hbm_to_vmem [thread:$0]  %s1309_s7, 2048, %s1138_s17, [#allocation9], %s1042_s21, %s1042_s21, %s1043_s22  }
  0x44   :  { %1032 = dma.done.wait [#allocation3], 512  }
  0x45   :  { %1033 = vsyncadd [#allocation3], 4294966784 }
  0x46   :  { %1034 = dma.done.wait [#allocation6], 2560  }
  0x47   :  { %1035 = vsyncadd [#allocation6], 4294964736 }
  0x48   :  { %1036 = dma.done.wait [#allocation9], 2048  }
  0x49   :  { %1037 = vsyncadd [#allocation9], 4294965248  ;;  %v92_v0 = vld [vmem:[%s1304_s2] sm:$0xff]  ;;  %v93_v1 = vld [vmem:[%s1304_s2 + $0x8] sm:$0xff]  ;;  %vm102_vm0 = vcmask 392192   ;;  %v1046_v25 = vmov 0.0   ;;  %v210_v38 = vlaneseq }
  0x4a   :  { %v94_v2 = vld [vmem:[%s1304_s2 + $0x10] sm:$0xff]  ;;  %v835_v3 = vpack.c.bf16 %v93_v1, %v92_v0  ;;  %v95_v4 = vld [vmem:[%s1304_s2 + $0x18] sm:$0xff]  ;;  %v96_v6 = vld [vmem:[%s1304_s2 + $0x20] sm:$0xff]  ;;  %297 = vmatprep.mubr.f32.mxu1 %v1046_v25  ;;  %vm220_vm1 = vcmask 261120   ;;  %s1050_s24 = smov [#allocation10]  }
  0x4b   :  { %v839_v5 = vpack.c.bf16 %v95_v4, %v94_v2  ;;  %v97_v7 = vld [vmem:[%s1304_s2 + $0x28] sm:$0xff]  ;;  %v88_v8 = vld [vmem:[#allocation2] sm:$0xff]  ;;  %v203_v10 = vld [vmem:[%s1305_s3 + $0x18] sm:$0xff]  ;;  %v211_v39 = vshrl.u32 %v210_v38, 7  ;;  %s674_s7 = sshll.u32 %s1050_s24, 4  ;;  %s675_s7 = int_to_ptr.vmem [resolvable:$true] %s674_s7 }
  0x4c   :  { %836 = vmatprep.subr.bf16.mxu0 %v835_v3  ;;  %759 = vmatprep.mubr.msk.f32.mxu0 %vm102_vm0, %v88_v8  ;;  %v201_v9 = vld [vmem:[%s1305_s3 + $0x8] sm:$0xff]  ;;  %v200_v12 = vld [vmem:[%s1305_s3] sm:$0xff]  ;;  %v202_v13 = vld [vmem:[%s1305_s3 + $0x10] sm:$0xff]  ;;  %v843_v14 = vpack.c.bf16 %v97_v7, %v96_v6  ;;  %s1010_s21 = scalar_lea.vmem %s675_s7, 32  ;;  %p1015_p5 = scmp.lt.s32.totalorder %s675_s7, %s675_s7 }
  0x4d   :  { %838 = vmatpush3.bf16.msra.mxu0 %v835_v3  ;;  %v847_v11 = vpack.c.bf16 %v203_v10, %v201_v9  ;;  %v849_v15 = vpack.c.bf16 %v202_v13, %v200_v12  ;;  %v89_v16 = vld [vmem:[#allocation2 + $0x8] sm:$0xff]  ;;  %v90_v17 = vld [vmem:[#allocation2 + $0x10] sm:$0xff]  ;;  %v91_v18 = vld [vmem:[#allocation2 + $0x18] sm:$0xff]  ;;  %v212_v40 = vsub.s32 0, %v211_v39  ;;  %v216_v42 = vsub.s32 1, %v211_v39  ;;  %p1011_p4 = scmp.ne.s32.totalorder %s675_s7, %s1010_s21  ;;  %p1016_p6 = scmp.lt.s32.totalorder %s1010_s21, %s1010_s21 }
  0x4e   :  { %840 = vmatprep.subr.bf16.mxu0 %v839_v5  ;;  %v205_v19 = vld [vmem:[%s1305_s3 + $0x28] sm:$0xff]  ;;  %v207_v20 = vld [vmem:[%s1305_s3 + $0x38] sm:$0xff]  ;;  %v204_v22 = vld [vmem:[%s1305_s3 + $0x20] sm:$0xff]  ;;  %v1237_v3 = vand.u32 127, %v210_v38 }
  0x4f   :  { %848 = vmatprep.subr.bf16.mxu1 %v847_v11  ;;  %v851_v21 = vpack.c.bf16 %v207_v20, %v205_v19  ;;  %v206_v23 = vld [vmem:[%s1305_s3 + $0x30] sm:$0xff]  ;;  %v98_v26 = vld [vmem:[#allocation5] sm:$0xff]  ;;  %v99_v30 = vld [vmem:[#allocation5 + $0x8] sm:$0xff]  ;;  %p1017_p7 = por %p1016_p6, %p1015_p5 }
  0x50   :  { %850 = vmatpush1.bf16.msra.mxu1 %v849_v15  ;;  %v853_v24 = vpack.c.bf16 %v206_v23, %v204_v22  ;;  %v100_v33 = vld [vmem:[#allocation5 + $0x10] sm:$0xff]  ;;  %v101_v36 = vld [vmem:[#allocation5 + $0x18] sm:$0xff]  ;;  %v208_v41 = vld [vmem:[%s1306_s4] sm:$0x3] }
  0x51   :  { %842 = vmatpush3.bf16.msra.mxu0 %v839_v5  ;;  %852 = vmatprep.subr.bf16.mxu1 %v851_v21  ;;  %v213_v43 = vrot.slane %v208_v41, %v212_v40  ;;  %v217_v45 = vrot.slane %v208_v41, %v216_v42  ;;  %v488_v38 = vld [vmem:[#allocation7 + $0x8] sm:$0xff]  ;;  %v489_v39 = vld [vmem:[#allocation7 + $0x10] sm:$0xff]  ;;  %v1047_v40 = vmov 0.0|0.0   ;;  %v490_v42 = vld [vmem:[#allocation7 + $0x18] sm:$0xff]  ;;  %p1018_p8 = pnand %p1017_p7, %p1011_p4 }
  0x52   :  { %844 = vmatprep.subr.bf16.mxu0 %v843_v14 }
  0x54   :  { %854 = vmatpush1.bf16.msra.mxu1 %v853_v24 }
  0x55   :  { %846 = vmatpush3.bf16.msra.mxu0 %v843_v14  ;;  %863 = vmatprep.subr.bf16.mxu1 %v1047_v40 }
  0x58   :  { %760 = vmatmul.mubr.msk.f32.vlgmr.msra.gmra.mrb[0].mxu0 %vm102_vm0, %v89_v16 }
  0x59   :  { %762 = vmatprep.mubr.msk.f32.mxu0 %vm102_vm0, %v90_v17 }
  0x5c   :  { %763 = vmatmul.mubr.msk.f32.gmra.mrb[2].mxu0 %vm102_vm0, %v91_v18  ;;  %vm1049_vm0 = vmmov 0  }
  0x5d   :  { %480 = vmatprep.mubr.f32.mxu0 %v1046_v25 }
 0x12b   :  { %v761_v27 = vpop.f32.mrb[0].mxu0 }
 0x12c   :  { %v181_v28 = vpop.f32.mrb[1].mxu0  ;;  %v187_v34 = vadd.f32 %v761_v27, %v99_v30 }
 0x12d   :  { %v182_v29 = vadd.f32 %v181_v28, %v98_v26 }
 0x12f   :  { %689 = vmatmul.mubr.msk.f32.vlgmr.msra.gmra.mrb[0].mxu1 %vm220_vm1, %v182_v29  ;;  %v764_v31 = vpop.f32.mrb[2].mxu0 }
 0x130   :  { %303 = vmatprep.mubr.f32.mxu1 %v1046_v25  ;;  %v191_v32 = vpop.f32.mrb[3].mxu0  ;;  %v197_v37 = vadd.f32 %v764_v31, %v101_v36 }
 0x131   :  { %v192_v35 = vadd.f32 %v191_v32, %v100_v33 }
 0x133   :  { %690 = vmatmul.mubr.msk.f32.gmra.mrb[2].mxu1 %vm220_vm1, %v187_v34 }
 0x134   :  { %309 = vmatprep.mubr.f32.mxu1 %v1046_v25 }
 0x137   :  { %691 = vmatmul.mubr.msk.f32.gmra.mrb[4].mxu1 %vm220_vm1, %v192_v35 }
 0x138   :  { %315 = vmatprep.mubr.f32.mxu1 %v1046_v25 }
 0x13b   :  { %692 = vmatmul.mubr.msk.f32.gmra.mrb[6].mxu1 %vm220_vm1, %v197_v37  ;;  %v487_v37 = vld [vmem:[#allocation7] sm:$0xff] }
 0x13c   :  { %v864_v41 = vpack.c.bf16 %v488_v38, %v487_v37  ;;  %797 = vmatprep.mubr.msk.f32.mxu1 %vm1049_vm0, %v1046_v25  ;;  %v586_v38 = vld [vmem:[#allocation8 + $0x60] sm:$0xff] }
 0x13e   :  { %865 = vmatpush3.bf16.msra.mxu1 %v864_v41 }
 0x13f   :  { %866 = vmatprep.subr.bf16.mxu1 %v1047_v40 }
 0x202   :  { %v299_v44 = vpop.f32.mrb[0].mxu1 }
 0x203   :  { %v300_v46 = vadd.f32 %v299_v44, %v213_v43  ;;  %v301_v47 = vpop.f32.mrb[1].mxu1  ;;  %v491_v44 = vld [vmem:[#allocation7 + $0x20] sm:$0xff] }
 0x204   :  { %v302_v48 = vadd.f32 %v301_v47, %v217_v45  ;;  %v493_v47 = vld [vmem:[#allocation7 + $0x30] sm:$0xff] }
 0x205   :  { %326 = vmax.xlane.f32.xlu0 %v300_v46 }
 0x206   :  { %v305_v49 = vpop.f32.mrb[2].mxu1  ;;  %v322_v53 = vmax.f32 %v302_v48, 0.0  ;;  %v494_v48 = vld [vmem:[#allocation7 + $0x38] sm:$0xff] }
 0x207   :  { %v306_v50 = vadd.f32 %v305_v49, %v213_v43  ;;  %v307_v51 = vpop.f32.mrb[3].mxu1  ;;  %v873_v49 = vpack.c.bf16 %v494_v48, %v493_v47 }
 0x208   :  { %v308_v52 = vadd.f32 %v307_v51, %v217_v45  ;;  %v496_v51 = vld [vmem:[#allocation7 + $0x48] sm:$0xff] }
 0x209   :  { %328 = vmax.xlane.f32.xlu0 %v306_v50 }
 0x20a   :  { %v323_v54 = vmax.f32 %v308_v52, 0.0  ;;  %v311_v55 = vpop.f32.mrb[4].mxu1 }
 0x20b   :  { %v312_v56 = vadd.f32 %v311_v55, %v213_v43  ;;  %v313_v57 = vpop.f32.mrb[5].mxu1 }
 0x20c   :  { %v1233_v58 = vpack.c.bf16 %v323_v54, %v322_v53  ;;  %v314_v59 = vadd.f32 %v313_v57, %v217_v45  ;;  %v497_v53 = vld [vmem:[#allocation7 + $0x50] sm:$0xff]  ;;  %v498_v54 = vld [vmem:[#allocation7 + $0x58] sm:$0xff]  ;;  %v500_v57 = vld [vmem:[#allocation7 + $0x68] sm:$0xff] }
 0x20d   :  { %330 = vmax.xlane.f32.xlu1 %v312_v56  ;;  %v879_v55 = vpack.c.bf16 %v498_v54, %v497_v53 }
 0x20e   :  { %v317_v60 = vpop.f32.mrb[6].mxu1  ;;  %v324_v0 = vmax.f32 %v314_v59, 0.0 }
 0x20f   :  { %v318_v61 = vadd.f32 %v317_v60, %v213_v43  ;;  %v319_v62 = vpop.f32.mrb[7].mxu1  ;;  %v867_v43 = vpack.c.bf16 %v490_v42, %v489_v39  ;;  %v501_v60 = vld [vmem:[#allocation7 + $0x70] sm:$0xff]  ;;  %v587_v39 = vld [vmem:[#allocation8 + $0x68] sm:$0xff] }
 0x210   :  { %v320_v63 = vadd.f32 %v319_v62, %v217_v45  ;;  %v492_v45 = vld [vmem:[#allocation7 + $0x28] sm:$0xff]  ;;  %v906_v41 = vpack.c.bf16 %v587_v39, %v586_v38 }
 0x211   :  { %332 = vmax.xlane.f32.xlu1 %v318_v61  ;;  %868 = vmatpush3.bf16.msra.mxu1 %v867_v43 }
 0x212   :  { %v325_v1 = vmax.f32 %v320_v63, 0.0  ;;  %869 = vmatprep.subr.bf16.mxu1 %v1047_v40 }
 0x214   :  { %v1235_v2 = vpack.c.bf16 %v325_v1, %v324_v0 }
 0x292   :  { %v327_v4 = vpop.xlane.xlu0 %326 }
 0x293   :  { %vm336_vm2 = vcmp.ge.f32.partialorder %v300_v46, %v327_v4  ;;  %v870_v46 = vpack.c.bf16 %v492_v45, %v491_v44  ;;  %v588_v44 = vld [vmem:[#allocation8 + $0x70] sm:$0xff]  ;;  %v589_v45 = vld [vmem:[#allocation8 + $0x78] sm:$0xff] }
 0x294   :  { %v340_v5 = vsel %vm336_vm2, %v1237_v3, 128 }
 0x295   :  { %v345_v6 = vshra.s32 %v340_v5, 16  ;;  %v344_v20 = vand.u32 65535, %v340_v5  ;;  %871 = vmatpush3.bf16.msra.mxu1 %v870_v46  ;;  %v909_v46 = vpack.c.bf16 %v589_v45, %v588_v44 }
 0x296   :  { %v329_v7 = vpop.xlane.xlu0 %328  ;;  %872 = vmatprep.subr.bf16.mxu1 %v1047_v40 }
 0x297   :  { %vm337_vm3 = vcmp.ge.f32.partialorder %v306_v50, %v329_v7  ;;  %v347_v8 = vcvt.s32.f32 %v345_v6  ;;  %v346_v23 = vcvt.s32.f32 %v344_v20  ;;  %v495_v50 = vld [vmem:[#allocation7 + $0x40] sm:$0xff] }
 0x298   :  { %v341_v9 = vsel %vm337_vm3, %v1237_v3, 128  ;;  %v876_v52 = vpack.c.bf16 %v496_v51, %v495_v50  ;;  %v702_v50 = vld [vmem:[%s1310_s8] ss:$0 sm:$0xff] }
 0x299   :  { %348 = vmin.xlane.f32.xlu0 %v347_v8  ;;  %v359_v10 = vshra.s32 %v341_v9, 16  ;;  %v358_v21 = vand.u32 65535, %v341_v9  ;;  %874 = vmatpush3.bf16.msra.mxu1 %v873_v49 }
 0x29a   :  { %v331_v11 = vpop.xlane.xlu1 %330  ;;  %875 = vmatprep.subr.bf16.mxu1 %v1047_v40 }
 0x29b   :  { %vm338_vm4 = vcmp.ge.f32.partialorder %v312_v56, %v331_v11  ;;  %v361_v12 = vcvt.s32.f32 %v359_v10  ;;  %v360_v28 = vcvt.s32.f32 %v358_v21  ;;  %v499_v56 = vld [vmem:[#allocation7 + $0x60] sm:$0xff] }
 0x29c   :  { %v342_v13 = vsel %vm338_vm4, %v1237_v3, 128  ;;  %v882_v59 = vpack.c.bf16 %v500_v57, %v499_v56 }
 0x29d   :  { %362 = vmin.xlane.f32.xlu1 %v361_v12  ;;  %v373_v14 = vshra.s32 %v342_v13, 16  ;;  %v372_v26 = vand.u32 65535, %v342_v13  ;;  %877 = vmatpush3.bf16.msra.mxu1 %v876_v52 }
 0x29e   :  { %v333_v15 = vpop.xlane.xlu1 %332  ;;  %878 = vmatprep.subr.bf16.mxu1 %v1047_v40 }
 0x29f   :  { %vm339_vm5 = vcmp.ge.f32.partialorder %v318_v61, %v333_v15  ;;  %v375_v16 = vcvt.s32.f32 %v373_v14  ;;  %v374_v32 = vcvt.s32.f32 %v372_v26  ;;  %v502_v61 = vld [vmem:[#allocation7 + $0x78] sm:$0xff] }
 0x2a0   :  { %v343_v17 = vsel %vm339_vm5, %v1237_v3, 128  ;;  %v885_v62 = vpack.c.bf16 %v502_v61, %v501_v60  ;;  %v577_v26 = vld [vmem:[#allocation8 + $0x18] sm:$0xff] }
 0x2a1   :  { %376 = vmin.xlane.f32.xlu0 %v375_v16  ;;  %v387_v18 = vshra.s32 %v343_v17, 16  ;;  %v386_v30 = vand.u32 65535, %v343_v17  ;;  %880 = vmatpush3.bf16.msra.mxu1 %v879_v55 }
 0x2a2   :  { %881 = vmatprep.subr.bf16.mxu1 %v1047_v40 }
 0x2a3   :  { %v389_v19 = vcvt.s32.f32 %v387_v18  ;;  %v388_v35 = vcvt.s32.f32 %v386_v30  ;;  %v580_v30 = vld [vmem:[#allocation8 + $0x30] sm:$0xff] }
 0x2a5   :  { %390 = vmin.xlane.f32.xlu1 %v389_v19  ;;  %883 = vmatpush3.bf16.msra.mxu1 %v882_v59 }
 0x2a6   :  { %884 = vmatprep.subr.bf16.mxu1 %v1047_v40 }
 0x2a9   :  { %886 = vmatpush3.bf16.msra.mxu1 %v885_v62 }
 0x326   :  { %v1243_v22 = vpop.xlane.xlu0 %348 }
 0x327   :  { %vm350_vm6 = vcmp.eq.f32.partialorder %v347_v8, %v1243_v22  ;;  %v355_v63 = vcvt.f32.s32 %v1243_v22  ;;  %v412_v22 = vld [vmem:[%s1307_s5] sm:$0x3] }
 0x328   :  { %v351_v24 = vsel %vm350_vm6, %v346_v23, inf  ;;  %v575_v23 = vld [vmem:[#allocation8 + $0x8] sm:$0xff] }
 0x329   :  { %352 = vmin.xlane.f32.xlu0 %v351_v24  ;;  %v356_v5 = vshll.u32 %v355_v63, 16 }
 0x32a   :  { %v1246_v27 = vpop.xlane.xlu1 %362 }
 0x32b   :  { %vm364_vm7 = vcmp.eq.f32.partialorder %v361_v12, %v1246_v27  ;;  %v369_v1 = vcvt.f32.s32 %v1246_v27  ;;  %v578_v27 = vld [vmem:[#allocation8 + $0x20] sm:$0xff] }
 0x32c   :  { %v365_v29 = vsel %vm364_vm7, %v360_v28, inf  ;;  %v579_v28 = vld [vmem:[#allocation8 + $0x28] sm:$0xff] }
 0x32d   :  { %366 = vmin.xlane.f32.xlu1 %v365_v29  ;;  %v370_v7 = vshll.u32 %v369_v1, 16  ;;  %v894_v29 = vpack.c.bf16 %v579_v28, %v578_v27 }
 0x32e   :  { %v1249_v31 = vpop.xlane.xlu0 %376 }
 0x32f   :  { %vm378_vm8 = vcmp.eq.f32.partialorder %v375_v16, %v1249_v31  ;;  %v383_v10 = vcvt.f32.s32 %v1249_v31  ;;  %v1048_v16 = vmov 1.0|1.0   ;;  %v581_v31 = vld [vmem:[#allocation8 + $0x38] sm:$0xff] }
 0x330   :  { %v379_v33 = vsel %vm378_vm8, %v374_v32, inf  ;;  %v897_v32 = vpack.c.bf16 %v581_v31, %v580_v30 }
 0x331   :  { %380 = vmin.xlane.f32.xlu0 %v379_v33  ;;  %v384_v15 = vshll.u32 %v383_v10, 16  ;;  %v583_v33 = vld [vmem:[#allocation8 + $0x48] sm:$0xff] }
 0x332   :  { %v1252_v34 = vpop.xlane.xlu1 %390 }
 0x333   :  { %vm392_vm9 = vcmp.eq.f32.partialorder %v389_v19, %v1252_v34  ;;  %v397_v13 = vcvt.f32.s32 %v1252_v34 }
 0x334   :  { %v393_v36 = vsel %vm392_vm9, %v388_v35, inf  ;;  %v584_v35 = vld [vmem:[#allocation8 + $0x50] sm:$0xff] }
 0x335   :  { %394 = vmin.xlane.f32.xlu1 %v393_v36  ;;  %v398_v18 = vshll.u32 %v397_v13, 16  ;;  %v585_v36 = vld [vmem:[#allocation8 + $0x58] sm:$0xff] }
 0x336   :  { %v903_v37 = vpack.c.bf16 %v585_v36, %v584_v35 }
 0x3b6   :  { %v353_v0 = vpop.xlane.xlu0 %352 }
 0x3b7   :  { %v354_v4 = vcvt.f32.s32 %v353_v0 }
 0x3b9   :  { %v357_v8 = vadd.s32 %v356_v5, %v354_v4 }
 0x3ba   :  { %v367_v6 = vpop.xlane.xlu1 %366 }
 0x3bb   :  { %v368_v9 = vcvt.f32.s32 %v367_v6  ;;  %vm400_vm10 = vcmp.eq.s32.totalorder %v1237_v3, %v357_v8 }
 0x3bd   :  { %v371_v11 = vadd.s32 %v370_v7, %v368_v9 }
 0x3be   :  { %v381_v12 = vpop.xlane.xlu0 %380 }
 0x3bf   :  { %v382_v14 = vcvt.f32.s32 %v381_v12  ;;  %vm401_vm11 = vcmp.eq.s32.totalorder %v1237_v3, %v371_v11 }
 0x3c0   :  { %vm855_vm12 = vmpackc.low %vm401_vm11, %vm400_vm10 }
 0x3c1   :  { %856 = vmatprep.subr.msk.bf16.mxu0 %vm855_vm12, %v1048_v16  ;;  %v385_v19 = vadd.s32 %v384_v15, %v382_v14 }
 0x3c2   :  { %v395_v17 = vpop.xlane.xlu1 %394  ;;  %858 = vmatpush1.bf16.msra.mxu0 %v1233_v58  ;;  %v574_v58 = vld [vmem:[#allocation8] sm:$0xff] }
 0x3c3   :  { %v396_v20 = vcvt.f32.s32 %v395_v17  ;;  %vm402_vm13 = vcmp.eq.s32.totalorder %v1237_v3, %v385_v19  ;;  %v888_v24 = vpack.c.bf16 %v575_v23, %v574_v58 }
 0x3c5   :  { %v399_v21 = vadd.s32 %v398_v18, %v396_v20 }
 0x3c7   :  { %vm403_vm14 = vcmp.eq.s32.totalorder %v1237_v3, %v399_v21  ;;  %v576_v3 = vld [vmem:[#allocation8 + $0x10] sm:$0xff] }
 0x3c8   :  { %vm859_vm15 = vmpackc.low %vm403_vm14, %vm402_vm13 }
 0x3c9   :  { %860 = vmatprep.subr.msk.bf16.mxu0 %vm859_vm15, %v1048_v16 }
 0x3ca   :  { %862 = vmatpush1.bf16.msra.mxu0 %v1235_v2  ;;  %v891_v2 = vpack.c.bf16 %v577_v26, %v576_v3 }
 0x3cb   :  { %887 = vmatprep.subr.bf16.mxu0 %v1047_v40 }
 0x3cd   :  { %701 = vmatmul.mubr.msk.f32.vlgmr.msra.gmra.mrb[4].mxu0 %vm220_vm1, %v412_v22 }
 0x3ce   :  { %832 = vmatprep.mubr.msk.f32.mxu0 %vm1049_vm0, %v1046_v25  ;;  %889 = vmatpush3.bf16.msra.mxu0 %v888_v24  ;;  %v582_v25 = vld [vmem:[#allocation8 + $0x40] sm:$0xff] }
 0x3cf   :  { %890 = vmatprep.subr.bf16.mxu0 %v1047_v40  ;;  %v900_v34 = vpack.c.bf16 %v583_v33, %v582_v25 }
 0x3d2   :  { %892 = vmatpush3.bf16.msra.mxu0 %v891_v2 }
 0x3d3   :  { %893 = vmatprep.subr.bf16.mxu0 %v1047_v40 }
 0x3d6   :  { %895 = vmatpush3.bf16.msra.mxu0 %v894_v29 }
 0x3d7   :  { %896 = vmatprep.subr.bf16.mxu0 %v1047_v40 }
 0x3da   :  { %898 = vmatpush3.bf16.msra.mxu0 %v897_v32 }
 0x3db   :  { %899 = vmatprep.subr.bf16.mxu0 %v1047_v40 }
 0x3de   :  { %901 = vmatpush3.bf16.msra.mxu0 %v900_v34 }
 0x3df   :  { %902 = vmatprep.subr.bf16.mxu0 %v1047_v40 }
 0x3e2   :  { %904 = vmatpush3.bf16.msra.mxu0 %v903_v37 }
 0x3e3   :  { %905 = vmatprep.subr.bf16.mxu0 %v1047_v40 }
 0x3e6   :  { %907 = vmatpush3.bf16.msra.mxu0 %v906_v41 }
 0x3e7   :  { %908 = vmatprep.subr.bf16.mxu0 %v1047_v40 }
 0x3ea   :  { %910 = vmatpush3.bf16.msra.mxu0 %v909_v46 }
 0x4a0   :  { %v482_v42 = vpop.f32.mrb[4].mxu0 }
 0x4a1   :  { %v484_v43 = vpop.f32.mrb[5].mxu0 }
 0x4a2   :  { %798 = vmatmul.mubr.f32.vlgmr.msra.gmra.mrb[8].mxu1 %v484_v43 }
 0x575   :  { %v569_v47 = vpop.f32.mrb[8].mxu1 }
 0x576   :  { %v573_v48 = vmul.f32 %v569_v47, %v482_v42  ;;  %v799_v49 = vpop.f32.mrb[9].mxu1 }
 0x578   :  { %833 = vmatmul.mubr.f32.vlgmr.msra.gmra.mrb[6].mxu0 %v573_v48 }
 0x64b   :  { %v663_v51 = vpop.f32.mrb[6].mxu0 }
 0x64c   :  { %v664_v52 = vadd.f32 %v702_v50, %v663_v51  ;;  %v834_v40 = vpop.f32.mrb[7].mxu0 }
 0x64e   :  { %667 = vst [vmem:[#allocation10] sm:$0x3] %v664_v52 }
 0x64f   :  { %1021 = shalt.err (!%p1018_p8)
}
 0x650   :  { %s1022_s25 = scalar_lea.hbm %s1311_s9, 32 }
 0x651   :  { %p1023_p9 = scmp.ne.s32.totalorder %s1311_s9, %s1022_s25  ;;  %p1026_p10 = scmp.lt.u32.totalorder %s1022_s25, %s1311_s9 }
 0x653   :  { %p1028_p11 = pnand %p1026_p10, %p1023_p9 }
 0x655   :  { %1031 = shalt.err (!%p1028_p11)
}
 0x656   :  { %677 = dma.vmem_to_hbm [thread:$0]  %s675_s7, 32, %s1311_s9, [#allocation4]  }
 0x657   :  { %1038 = dma.done.wait [#allocation4], 32  }
 0x658   :  { %1039 = vsyncadd [#allocation4], 4294967264 }
 0x659   :  { %681 = vsyncpa [#allocation3], 1 }
 0x65a   :  { %682 = vsyncpa [#allocation6], 1 }
 0x65b   :  { %683 = vsyncpa [#allocation9], 1 }
 0x65c   :  { %684 = vsyncpa [#allocation4], 1 }

</bundles_post_ra>
